<compile_context>
chip_gen: v7x
topology: tpu7x:2x2x1
jax: 0.10.0
libtpu: 0.0.40
codegen_flags: <defaults>
</compile_context>

<pallas_src>
import functools

import jax
import jax.numpy as jnp
import numpy as np
from jax.experimental import pallas as pl
from jax.experimental.pallas import tpu as pltpu


def _round_up(x: int, m: int) -> int:
    return (x + m - 1) // m * m


def _tpu_vmem_capacity() -> int:
    """Per-TensorCore VMEM bytes; conservative v7x value if the query fails."""
    try:
        info = pltpu.get_tpu_info()
        cap = getattr(info, "vmem_capacity_bytes", None)
        if cap:
            return int(cap)
    except Exception:
        pass
    return 64 * 1024 * 1024


def _agg_vmem_bytes(tm: int, n_src: int, w_tot: int) -> int:
    """Honest VMEM footprint of the aggregation kernel at dst-tile size tm."""
    adj_stream = 2 * tm * n_src * 1        # int8 adj tiles, double-buffered
    adj_cast = tm * n_src * 2              # in-kernel int8 -> bf16 temp
    zw_res = 2 * n_src * w_tot * 2         # hi+lo bf16 planes, resident, single-buffered
    acc_tmp = 2 * tm * w_tot * 4           # f32 acc + scaled-result temporaries
    out_stream = 2 * tm * w_tot * 4        # f32 output tiles, double-buffered
    return adj_stream + adj_cast + zw_res + acc_tmp + out_stream


def _pick_tile_rows(n: int, n_src: int, w_tot: int, cap: int, requested=None) -> int:
    """Destination-row tile (multiple of 32 for the (32,128) int8 sublane tile)."""
    n_cap = _round_up(n, 32)
    if requested is not None:
        return max(32, min(_round_up(requested, 32), n_cap))
    budget = min(int(cap * 0.55), 96 << 20)          # generation-gated working budget
    tm_max = 1024 if cap >= (100 << 20) else 512     # v5e/v6e (128 MiB) vs v7x (64 MiB)
    tm = 32
    t = 32
    while t <= min(tm_max, n_cap):
        if _agg_vmem_bytes(t, n_src, w_tot) <= budget:
            tm = t
        t += 32
    return tm


def _pick_src_tile(n_src: int, in_dim: int, w_tot: int, cap: int) -> int:
    """Prologue source-row tile: multiple of 128 that divides n_src and fits budget."""
    per_row = in_dim * 4 * 2 + w_tot * 16            # h (dbl-buf f32) + z/zw temps + hi/lo outs
    budget = min(int(cap * 0.25), 24 << 20)
    ts_cap = max(128, (budget // per_row) // 128 * 128)
    best = 128
    m = n_src // 128
    for d in range(1, m + 1):
        if m % d == 0 and d * 128 <= ts_cap:
            best = d * 128
    return best


def prepare_adjacency(adj, n_dst_pad: int, n_src_pad: int):
    """One-time conversion of a dense {0,1} adjacency adj[dst, src] to the packed int8
    streaming layout.  Callers may cache/reuse the result across forward calls."""
    adj = jnp.asarray(adj)
    nd, ns = adj.shape
    a8 = (adj != 0).astype(jnp.int8)
    out = jnp.zeros((n_dst_pad, n_src_pad), jnp.int8)
    return out.at[:nd, :ns].set(a8)


# ----------------------------------------------------------------------------------
# Kernel 1 (prologue): tiled over source rows, two sequential phases.
#   phase 0: global logit max (for softmax stabilization) into a VMEM scratch
#   phase 1: z = h @ W, per-source weight w = exp(s - smax), and the packed operand
#            [ w*z | w | 0... ] emitted as bf16 hi/lo planes (hi + lo ~= f32 value).
# ----------------------------------------------------------------------------------
def gat_prologue_kernel(h_ref, w_ref, a_ref, hi_ref, lo_ref, smax_ref, *, out_dim):
    phase = pl.program_id(0)

    @pl.when(jnp.logical_and(phase == 0, pl.program_id(1) == 0))
    def _():
        smax_ref[...] = jnp.full((1, 1), -jnp.inf, jnp.float32)

    z = jnp.dot(h_ref[...], w_ref[...], preferred_element_type=jnp.float32)   # (ts, Wtot)
    # Per-source logit s_j = a_src . z_j (the a_dst . z_i term cancels in the softmax
    # because the module applies no LeakyReLU).
    s = jnp.sum(z * a_ref[...], axis=-1, keepdims=True)                        # (ts, 1)

    @pl.when(phase == 0)
    def _():
        smax_ref[...] = jnp.maximum(smax_ref[...], jnp.max(s, axis=0, keepdims=True))

    @pl.when(phase == 1)
    def _():
        wgt = jnp.exp(s - smax_ref[...])                                       # (ts, 1), <= ~1
        lane = jax.lax.broadcasted_iota(jnp.int32, z.shape, 1)
        # lanes [0:out_dim] = w*z, lane out_dim = w (softmax denominator), rest = 0
        zw = jnp.where(lane == out_dim, wgt, wgt * z)                          # f32
        hi = zw.astype(jnp.bfloat16)
        lo = (zw - hi.astype(jnp.float32)).astype(jnp.bfloat16)                # residual plane
        hi_ref[...] = hi
        lo_ref[...] = lo


# ----------------------------------------------------------------------------------
# Kernel 2 (main, grid over destination-row tiles): two native-bf16 MXU matmuls
# (hi + lo planes) accumulated in f32 produce both the weighted message sum and the
# softmax denominator; then one row scale.  adj streams as int8 and is cast to bf16
# (exact for 0/1) just before the matmul.
# ----------------------------------------------------------------------------------
def gat_aggregate_kernel(adj_ref, hi_ref, lo_ref, out_ref, *, out_dim):
    adj = adj_ref[...].astype(jnp.bfloat16)                                    # (TM, Nsrc)
    acc = (jnp.dot(adj, hi_ref[...], preferred_element_type=jnp.float32)
           + jnp.dot(adj, lo_ref[...], preferred_element_type=jnp.float32))    # (TM, Wtot)
    denom = acc[:, out_dim:out_dim + 1]                                        # static lane slice
    # Isolated destination nodes (denom == 0) -> 0, matching DGL's zero fill.
    inv = jnp.where(denom > 0.0, 1.0 / denom, 0.0)
    out_ref[...] = acc * inv                       # lane-dense (TM, Wtot) store


def graph_layer_forward(h, w_fc, w_attn, adj, *, tile_rows=None, return_padded=False):
    """GraphLayer forward.

    h      : (N, in_dim)        node features
    w_fc   : (out_dim, in_dim)  fc.weight        (nn.Linear, bias=False)
    w_attn : (1, 2*out_dim)     attn_fc.weight   (nn.Linear, bias=False)
    adj    : (N, N)             adj[dst, src] = 1 iff edge src -> dst, any dtype;
                                OR an already-prepared padded int8 array from
                                prepare_adjacency (skips the O(N^2) wrapper pad/cast).
    returns: (N, out_dim)       (or the padded (n_dst, w_tot) slab if return_padded)
    """
    n, in_dim = h.shape
    out_dim = w_fc.shape[0]
    f32 = jnp.float32
    cap = _tpu_vmem_capacity()

    # Lane-dense padded sizes: out_dim z columns + 1 denominator column -> 128 lanes.
    w_tot = _round_up(out_dim + 1, 128)
    n_src = _round_up(n, 128)                       # src axis (adj minor dim / operand rows)
    ts = _pick_src_tile(n_src, in_dim, w_tot, cap)  # prologue src-row tile (divides n_src)
    tm = _pick_tile_rows(n, n_src, w_tot, cap, tile_rows)
    n_dst = _round_up(n, tm)

    # Zero-padded operands (padded src rows never contribute: their adj columns are 0;
    # padded dst rows produce denom == 0 and are sliced off / left as zeros).
    h_p = jnp.zeros((n_src, in_dim), f32).at[:n, :].set(jnp.asarray(h, f32))
    w_p = jnp.zeros((in_dim, w_tot), f32).at[:, :out_dim].set(jnp.asarray(w_fc, f32).T)
    a_p = jnp.zeros((1, w_tot), f32).at[0, :out_dim].set(jnp.asarray(w_attn, f32)[0, :out_dim])

    adj = jnp.asarray(adj)
    if adj.dtype == jnp.int8 and adj.shape == (n_dst, n_src):
        adj_p = adj                                 # already in the streaming layout
    else:
        adj_p = prepare_adjacency(adj, n_dst, n_src)

    vmem = pl.BlockSpec(memory_space=pltpu.MemorySpace.VMEM)

    # --- Kernel 1: packed softmax-weighted operand (hi/lo bf16 planes), tiled ---------
    prologue_vmem = (2 * ts * in_dim * 4 + in_dim * w_tot * 4 + w_tot * 4
                     + 2 * ts * w_tot * 4 + 2 * 2 * ts * w_tot * 2 + (2 << 20))
    hi, lo = pl.pallas_call(
        functools.partial(gat_prologue_kernel, out_dim=out_dim),
        out_shape=(jax.ShapeDtypeStruct((n_src, w_tot), jnp.bfloat16),
                   jax.ShapeDtypeStruct((n_src, w_tot), jnp.bfloat16)),
        grid=(2, n_src // ts),                      # (phase, src tile), both sequential
        in_specs=[
            pl.BlockSpec((ts, in_dim), lambda p, i: (i, 0)),   # h row tile, streamed
            vmem,                                              # W (in_dim, w_tot), resident
            vmem,                                              # a_src row, resident
        ],
        out_specs=[
            pl.BlockSpec((ts, w_tot), lambda p, i: (i, 0)),    # hi plane tile
            pl.BlockSpec((ts, w_tot), lambda p, i: (i, 0)),    # lo plane tile
        ],
        scratch_shapes=[pltpu.VMEM((1, 1), jnp.float32)],      # running global max
        compiler_params=pltpu.CompilerParams(
            dimension_semantics=("arbitrary", "arbitrary"),    # phases must run sequentially
            vmem_limit_bytes=int(min(max(prologue_vmem, 16 << 20), int(cap * 0.9))),
        ),
    )(h_p, w_p, a_p)

    # --- Kernel 2: aggregate, tiled over destination rows ------------------------------
    # TODO(synk): for graphs where the resident hi/lo planes (~512 B/node) exceed VMEM,
    # add a src grid axis with an f32 accumulator instead of keeping the full src axis
    # resident.
    agg_vmem = _agg_vmem_bytes(tm, n_src, w_tot)
    out_p = pl.pallas_call(
        functools.partial(gat_aggregate_kernel, out_dim=out_dim),
        out_shape=jax.ShapeDtypeStruct((n_dst, w_tot), f32),
        grid=(n_dst // tm,),
        in_specs=[
            pl.BlockSpec((tm, n_src), lambda i: (i, 0)),       # int8 adj row tile, streamed
            vmem,                                              # hi plane, resident single-buffer
            vmem,                                              # lo plane, resident single-buffer
        ],
        out_specs=pl.BlockSpec((tm, w_tot), lambda i: (i, 0)), # lane-dense output tile
        compiler_params=pltpu.CompilerParams(
            dimension_semantics=("parallel",),                 # dst tiles split across TCs
            vmem_limit_bytes=int(min(max(agg_vmem + (4 << 20), 16 << 20), int(cap * 0.9))),
        ),
    )(adj_p, hi, lo)

    if return_padded:
        return out_p
    return out_p[:n, :out_dim]


# ----------------------------------------------------------------------------------
# Pure numpy (float64) reference implementing the module's masked-softmax semantics.
# ----------------------------------------------------------------------------------
def graph_layer_reference(h, w_fc, w_attn, adj):
    h = np.asarray(h, np.float64)
    w_fc = np.asarray(w_fc, np.float64)
    w_attn = np.asarray(w_attn, np.float64)
    adj = np.asarray(adj, np.float64)
    out_dim = w_fc.shape[0]
    z = h @ w_fc.T
    a_src = w_attn[0, :out_dim]
    a_dst = w_attn[0, out_dim:]
    e = (z @ a_dst)[:, None] + (z @ a_src)[None, :]       # e[dst, src]
    mask = adj > 0.0
    m = np.max(np.where(mask, e, -np.inf), axis=-1, keepdims=True)
    m = np.where(np.isfinite(m), m, 0.0)
    p = np.where(mask, np.exp(np.where(mask, e, m) - m), 0.0)
    denom = np.sum(p, axis=-1, keepdims=True)
    alpha = p * np.where(denom > 0.0, 1.0 / denom, 0.0)
    return alpha @ z


if __name__ == "__main__":
    N, IN_DIM, OUT_DIM = 96, 16, 32

    key = jax.random.PRNGKey(0)
    k_h, k_w, k_a, k_g = jax.random.split(key, 4)

    h = jax.random.normal(k_h, (N, IN_DIM), jnp.float32)
    w_fc = jax.random.normal(k_w, (OUT_DIM, IN_DIM), jnp.float32) * 0.1      # fc.weight
    w_attn = jax.random.normal(k_a, (1, 2 * OUT_DIM), jnp.float32) * 0.1     # attn_fc.weight
    # Deterministic random graph: adj[dst, src] = 1 with p=0.3, plus self-loops.
    adj = (jax.random.uniform(k_g, (N, N)) < 0.3).astype(jnp.float32)
    adj = jnp.maximum(adj, jnp.eye(N, dtype=jnp.float32))

    # tile_rows=32 -> 3 destination tiles, exercising the grid / pipelining path.
    out = graph_layer_forward(h, w_fc, w_attn, adj, tile_rows=32)
    out = jax.block_until_ready(out)

    ref = graph_layer_reference(h, w_fc, w_attn, adj)
    np.testing.assert_allclose(np.asarray(out), ref, rtol=1e-4, atol=1e-4)

    print("KERNEL_OK")
</pallas_src>

<mosaic_0001>
module attributes {stable_mosaic.version = 11 : i64} {
  func.func @gat_prologue_kernel(%arg0: i32, %arg1: i32, %arg2: memref<128x16xf32, #tpu.memory_space<vmem>>, %arg3: memref<16x128xf32, #tpu.memory_space<vmem>>, %arg4: memref<1x128xf32, #tpu.memory_space<vmem>>, %arg5: memref<128x128xbf16, #tpu.memory_space<vmem>>, %arg6: memref<128x128xbf16, #tpu.memory_space<vmem>>, %arg7: memref<1x1xf32, #tpu.memory_space<vmem>>) attributes {dimension_semantics = [#tpu.dimension_semantics<arbitrary>, #tpu.dimension_semantics<arbitrary>], iteration_bounds = array<i64: 2, 1>, scalar_prefetch = 0 : i64, scratch_operands = 1 : i64, tpu.core_type = #tpu.core_type<tc>, window_params = [{transform_indices = @transform_0, window_bounds = array<i64: 128, 16>}, {pipeline_mode = #tpu.pipeline_mode<synchronous>, transform_indices = @transform_1, window_bounds = array<i64: 16, 128>}, {pipeline_mode = #tpu.pipeline_mode<synchronous>, transform_indices = @transform_2, window_bounds = array<i64: 1, 128>}, {transform_indices = @transform_3, window_bounds = array<i64: 128, 128>}, {transform_indices = @transform_4, window_bounds = array<i64: 128, 128>}]} {
    %c0_i32 = arith.constant 0 : i32
    %0 = arith.cmpi eq, %arg0, %c0_i32 : i32
    %c0_i32_0 = arith.constant 0 : i32
    %1 = arith.cmpi eq, %arg1, %c0_i32_0 : i32
    %2 = arith.andi %0, %1 : i1
    %3 = arith.extui %2 : i1 to i32
    %c0_i32_1 = arith.constant 0 : i32
    %4 = arith.cmpi ne, %3, %c0_i32_1 : i32
    scf.if %4 {
      %cst_11 = arith.constant 0xFF800000 : f32
      %19 = vector.broadcast %cst_11 : f32 to vector<1x1xf32>
      %c0_12 = arith.constant 0 : index
      %c0_13 = arith.constant 0 : index
      %20 = vector.load %arg7[%c0_12, %c0_13] : memref<1x1xf32, #tpu.memory_space<vmem>>, vector<1x1xf32>
      tpu.vector_store %arg7[%c0_12, %c0_13], %19 {strides = array<i32>} : memref<1x1xf32, #tpu.memory_space<vmem>>, vector<1x1xf32>,
    } else {
    }
    %c0 = arith.constant 0 : index
    %c0_2 = arith.constant 0 : index
    %5 = vector.load %arg2[%c0, %c0_2] : memref<128x16xf32, #tpu.memory_space<vmem>>, vector<128x16xf32>
    %c0_3 = arith.constant 0 : index
    %c0_4 = arith.constant 0 : index
    %6 = vector.load %arg3[%c0_3, %c0_4] : memref<16x128xf32, #tpu.memory_space<vmem>>, vector<16x128xf32>
    %cst = arith.constant dense<0.000000e+00> : vector<128x128xf32>
    %7 = tpu.matmul %5, %6, %cst {dimension_numbers = #tpu.dot_dimension_numbers<[1], [0], [0], [1], [0, 0, 1, 1], [], []>} : vector<128x16xf32>, vector<16x128xf32>, vector<128x128xf32> -> vector<128x128xf32>
    %c0_5 = arith.constant 0 : index
    %c0_6 = arith.constant 0 : index
    %8 = vector.load %arg4[%c0_5, %c0_6] : memref<1x128xf32, #tpu.memory_space<vmem>>, vector<1x128xf32>
    %9 = vector.broadcast %8 : vector<1x128xf32> to vector<128x128xf32>
    %10 = arith.mulf %7, %9 : vector<128x128xf32>
    %cst_7 = arith.constant dense<0.000000e+00> : vector<128xf32>
    %11 = vector.multi_reduction <add>, %10, %cst_7 [1] : vector<128x128xf32> to vector<128xf32>
    %12 = vector.shape_cast %11 : vector<128xf32> to vector<128x1xf32>
    %c0_i32_8 = arith.constant 0 : i32
    %13 = arith.cmpi eq, %arg0, %c0_i32_8 : i32
    %14 = arith.extui %13 : i1 to i32
    %c0_i32_9 = arith.constant 0 : i32
    %15 = arith.cmpi ne, %14, %c0_i32_9 : i32
    scf.if %15 {
      %c0_11 = arith.constant 0 : index
      %c0_12 = arith.constant 0 : index
      %19 = vector.load %arg7[%c0_11, %c0_12] : memref<1x1xf32, #tpu.memory_space<vmem>>, vector<1x1xf32>
      %cst_13 = arith.constant dense<0xFF800000> : vector<1xf32>
      %20 = vector.multi_reduction <maximumf>, %12, %cst_13 [0] : vector<128x1xf32> to vector<1xf32>
      %21 = vector.shape_cast %20 : vector<1xf32> to vector<1x1xf32>
      %22 = arith.maximumf %19, %21 : vector<1x1xf32>
      %c0_14 = arith.constant 0 : index
      %c0_15 = arith.constant 0 : index
      %23 = vector.load %arg7[%c0_14, %c0_15] : memref<1x1xf32, #tpu.memory_space<vmem>>, vector<1x1xf32>
      tpu.vector_store %arg7[%c0_14, %c0_15], %22 {strides = array<i32>} : memref<1x1xf32, #tpu.memory_space<vmem>>, vector<1x1xf32>,
    } else {
    }
    %c1_i32 = arith.constant 1 : i32
    %16 = arith.cmpi eq, %arg0, %c1_i32 : i32
    %17 = arith.extui %16 : i1 to i32
    %c0_i32_10 = arith.constant 0 : i32
    %18 = arith.cmpi ne, %17, %c0_i32_10 : i32
    scf.if %18 {
      %c0_11 = arith.constant 0 : index
      %c0_12 = arith.constant 0 : index
      %19 = vector.load %arg7[%c0_11, %c0_12] : memref<1x1xf32, #tpu.memory_space<vmem>>, vector<1x1xf32>
      %20 = vector.broadcast %19 : vector<1x1xf32> to vector<128x1xf32>
      %21 = arith.subf %12, %20 : vector<128x1xf32>
      %22 = math.exp %21 : vector<128x1xf32>
      %23 = tpu.iota {dimensions = array<i32: 1>} : vector<128x128xi32>
      %c32_i32 = arith.constant 32 : i32
      %24 = vector.broadcast %c32_i32 : i32 to vector<128x128xi32>
      %25 = arith.cmpi eq, %23, %24 : vector<128x128xi32>
      %26 = vector.broadcast %22 : vector<128x1xf32> to vector<128x128xf32>
      %27 = arith.mulf %26, %7 : vector<128x128xf32>
      %28 = vector.shape_cast %22 : vector<128x1xf32> to vector<128x1xf32>
      %29 = vector.broadcast %28 : vector<128x1xf32> to vector<128x128xf32>
      %30 = arith.select %25, %29, %27 : vector<128x128xi1>, vector<128x128xf32>
      %31 = arith.truncf %30 : vector<128x128xf32> to vector<128x128xbf16>
      %32 = arith.extf %31 : vector<128x128xbf16> to vector<128x128xf32>
      %33 = arith.subf %30, %32 : vector<128x128xf32>
      %34 = arith.truncf %33 : vector<128x128xf32> to vector<128x128xbf16>
      %c0_13 = arith.constant 0 : index
      %c0_14 = arith.constant 0 : index
      %35 = vector.load %arg5[%c0_13, %c0_14] : memref<128x128xbf16, #tpu.memory_space<vmem>>, vector<128x128xbf16>
      tpu.vector_store %arg5[%c0_13, %c0_14], %31 {strides = array<i32>} : memref<128x128xbf16, #tpu.memory_space<vmem>>, vector<128x128xbf16>,
      %c0_15 = arith.constant 0 : index
      %c0_16 = arith.constant 0 : index
      %36 = vector.load %arg6[%c0_15, %c0_16] : memref<128x128xbf16, #tpu.memory_space<vmem>>, vector<128x128xbf16>
      tpu.vector_store %arg6[%c0_15, %c0_16], %34 {strides = array<i32>} : memref<128x128xbf16, #tpu.memory_space<vmem>>, vector<128x128xbf16>,
    } else {
    }
    return
  }
  func.func @transform_0(%arg0: i32, %arg1: i32) -> (i32, i32) {
    %c0_i32 = arith.constant 0 : i32
    %c0_i32_0 = arith.constant 0 : i32
    return %arg1, %c0_i32 : i32, i32
  }
  func.func @transform_1(%arg0: i32, %arg1: i32) -> (i32, i32) {
    %c0_i32 = arith.constant 0 : i32
    %c0_i32_0 = arith.constant 0 : i32
    %c0_i32_1 = arith.constant 0 : i32
    return %c0_i32, %c0_i32_0 : i32, i32
  }
  func.func @transform_2(%arg0: i32, %arg1: i32) -> (i32, i32) {
    %c0_i32 = arith.constant 0 : i32
    %c0_i32_0 = arith.constant 0 : i32
    %c0_i32_1 = arith.constant 0 : i32
    return %c0_i32, %c0_i32_0 : i32, i32
  }
  func.func @transform_3(%arg0: i32, %arg1: i32) -> (i32, i32) {
    %c0_i32 = arith.constant 0 : i32
    %c0_i32_0 = arith.constant 0 : i32
    return %arg1, %c0_i32 : i32, i32
  }
  func.func @transform_4(%arg0: i32, %arg1: i32) -> (i32, i32) {
    %c0_i32 = arith.constant 0 : i32
    %c0_i32_0 = arith.constant 0 : i32
    return %arg1, %c0_i32 : i32, i32
  }
}

</mosaic_0001>

<bundles_post_ra>
// kernel: tpu_custom_call.1
= control target key start
LH: loop header
LB: loop body
LE: loop exit
PB: predicated region body
PF: predicated region fallthrough
CT: control target
= control target key end

     0   :  { %10 = vsyncpa [#allocation4], 0  ;;  %s1710_s0 = inlined_call_operand.vmem [shape: f32[128,16], index: 0, kind: input, shape index: {}]   ;;  %s1711_s1 = inlined_call_operand.vmem [shape: f32[16,128], index: 1, kind: input, shape index: {}]   ;;  %s1712_s2 = inlined_call_operand.vmem [shape: f32[1,128], index: 2, kind: input, shape index: {}]   ;;  %s1713_s3 = inlined_call_operand.hbm [shape: bf16[128,128], index: 3, kind: output, shape index: {0}]   ;;  %s1714_s4 = inlined_call_operand.hbm [shape: bf16[128,128], index: 4, kind: output, shape index: {1}]  }
   0x1   :  { %11 = vsyncpa [#allocation6], 0  ;;  %s1405_s15 = smov 0   ;;  %s1407_s16 = smov 0  }
   0x2   :  { %s1409_s17 = smov 0  }
   0x3 LB: > { %s972_s18 = sadd.s32 4294967295, %s1372_s17   ;;  %s29_s19 = sadd.s32 1, %s1368_s16  ;;  %s1372_s17 = sphi %s1409_s17, %s17_s17   ;;  %s1368_s16 = sphi %s1407_s16, %s1717_s16   ;;  %s1364_s15 = sphi %s1405_s15, %s1716_s15  }
   0x4   : > { %p31_p0 = scmp.ge.s32.totalorder %s29_s19, 2  ;;  %p975_p1 = scmp.ge.s32.totalorder %s1372_s17, 1 }
   0x5   : > { %p180_p2 = scmp.lt.s32.totalorder %s1372_s17, 3 }
   0x6   : > { %s1719_s19 = smov (%p31_p0, %s29_s19), 0 }
   0x7   : > { %p181_p3 = pnand %p975_p1, %p180_p2 }
   0x8   : > { %p209_p4 = scmp.eq.s32.totalorder (!%p181_p3), %s1364_s15, 0 }
   0x9   : > { %184 = sbr.rel (%p181_p3) target bundleno = 678 (0x2a6), region = 32 }
  0x10   : > { %214 = sbr.rel (!%p209_p4) target bundleno = 23 (0x17), region = 36  ;;  %vm215_vm0 = vcmask (%p209_p4), 0   ;;  %v1374_v0 = vmov (%p209_p4), -inf  }
  0x11   : > { %216 = vst.msk [vmem:[#allocation2] sm:$0x1] (%p209_p4), %vm215_vm0, %v1374_v0 }
  0x17 PF: > { %v233_v1 = vld [vmem:[%s1711_s1] sm:$0xff]  ;;  %v234_v2 = vld [vmem:[%s1711_s1 + $0x8] sm:$0xff]  ;;  %vm235_vm1 = vcmask 130048   ;;  %v219_v8 = vld [vmem:[%s1710_s0 + $0x10] sm:$0xff]  ;;  %p994_p5 = scmp.ne.s32.totalorder %s1364_s15, 0 }
  0x18   : > { %v217_v3 = vld [vmem:[%s1710_s0] sm:$0xff]  ;;  %v1208_v4 = vpack.c.bf16 %v234_v2, %v233_v1  ;;  %v218_v6 = vld [vmem:[%s1710_s0 + $0x8] sm:$0xff]  ;;  %v227_v9 = vld [vmem:[%s1710_s0 + $0x50] sm:$0xff]  ;;  %vm510_vm2 = vcmask (!%p994_p5), 0  }
  0x19   : > { %1184 = vmatprep.mubr.msk.f32.mxu0 %vm235_vm1, %v217_v3  ;;  %v225_v5 = vld [vmem:[%s1710_s0 + $0x40] sm:$0xff]  ;;  %v226_v7 = vld [vmem:[%s1710_s0 + $0x48] sm:$0xff]  ;;  %v220_v10 = vld [vmem:[%s1710_s0 + $0x18] sm:$0xff] }
  0x1a   : > { %1196 = vmatprep.mubr.msk.f32.mxu1 %vm235_vm1, %v225_v5  ;;  %1209 = vmatprep.subr.bf16.mxu0 %v1208_v4  ;;  %v228_v11 = vld [vmem:[%s1710_s0 + $0x58] sm:$0xff]  ;;  %v221_v12 = vld [vmem:[%s1710_s0 + $0x20] sm:$0xff]  ;;  %v222_v14 = vld [vmem:[%s1710_s0 + $0x28] sm:$0xff] }
  0x1b   : > { %1212 = vmatprep.subr.bf16.mxu1 %v1208_v4  ;;  %1211 = vmatpush3.bf16.msra.mxu0 %v1208_v4  ;;  %v229_v13 = vld [vmem:[%s1710_s0 + $0x60] sm:$0xff]  ;;  %v230_v15 = vld [vmem:[%s1710_s0 + $0x68] sm:$0xff]  ;;  %v223_v16 = vld [vmem:[%s1710_s0 + $0x30] sm:$0xff] }
  0x1c   : > { %1213 = vmatpush3.bf16.msra.mxu1 %v1208_v4  ;;  %v231_v17 = vld [vmem:[%s1710_s0 + $0x70] sm:$0xff]  ;;  %v224_v18 = vld [vmem:[%s1710_s0 + $0x38] sm:$0xff]  ;;  %v993_v20 = vld [vmem:[%s1712_s2] ss:$0 sm:$0xff] }
  0x1d   : > { %v232_v19 = vld [vmem:[%s1710_s0 + $0x78] sm:$0xff] }
  0x1e   : > { %1185 = vmatmul.mubr.msk.f32.vlgmr.msra.gmra.mrb[0].mxu0 %vm235_vm1, %v218_v6 }
  0x1f   : > { %1197 = vmatmul.mubr.msk.f32.vlgmr.msra.gmra.mrb[0].mxu1 %vm235_vm1, %v226_v7  ;;  %1187 = vmatprep.mubr.msk.f32.mxu0 %vm235_vm1, %v219_v8 }
  0x20   : > { %1199 = vmatprep.mubr.msk.f32.mxu1 %vm235_vm1, %v227_v9 }
  0x22   : > { %1188 = vmatmul.mubr.msk.f32.gmra.mrb[2].mxu0 %vm235_vm1, %v220_v10 }
  0x23   : > { %1200 = vmatmul.mubr.msk.f32.gmra.mrb[2].mxu1 %vm235_vm1, %v228_v11  ;;  %1190 = vmatprep.mubr.msk.f32.mxu0 %vm235_vm1, %v221_v12 }
  0x24   : > { %1202 = vmatprep.mubr.msk.f32.mxu1 %vm235_vm1, %v229_v13 }
  0x26   : > { %1191 = vmatmul.mubr.msk.f32.gmra.mrb[4].mxu0 %vm235_vm1, %v222_v14 }
  0x27   : > { %1203 = vmatmul.mubr.msk.f32.gmra.mrb[4].mxu1 %vm235_vm1, %v230_v15  ;;  %1193 = vmatprep.mubr.msk.f32.mxu0 %vm235_vm1, %v223_v16 }
  0x28   : > { %1205 = vmatprep.mubr.msk.f32.mxu1 %vm235_vm1, %v231_v17 }
  0x2a   : > { %1194 = vmatmul.mubr.msk.f32.gmra.mrb[6].mxu0 %vm235_vm1, %v224_v18 }
  0x2b   : > { %1206 = vmatmul.mubr.msk.f32.gmra.mrb[6].mxu1 %vm235_vm1, %v232_v19 }
  0xf1   : > { %v1500_v21 = vpop.f32.mrb[0].mxu0 }
  0xf2   : > { %v1502_v22 = vpop.f32.mrb[0].mxu1  ;;  %v1504_v23 = vpop.f32.mrb[1].mxu0  ;;  %v437_v26 = vmul.f32 %v1500_v21, %v993_v20 }
  0xf3   : > { %v1506_v24 = vpop.f32.mrb[1].mxu1  ;;  %v445_v25 = vmul.f32 %v1502_v22, %v993_v20  ;;  %v436_v29 = vmul.f32 %v993_v20, %v1504_v23 }
  0xf4   : > { %454 = vadd.xlane.f32.xlu0 %v437_v26  ;;  %v444_v36 = vmul.f32 %v993_v20, %v1506_v24 }
  0xf5   : > { %470 = vadd.xlane.f32.xlu1 %v445_v25  ;;  %v1510_v27 = vpop.f32.mrb[2].mxu0 }
  0xf6   : > { %v1512_v28 = vpop.f32.mrb[2].mxu1  ;;  %v439_v30 = vmul.f32 %v1510_v27, %v993_v20  ;;  %v1516_v31 = vpop.f32.mrb[3].mxu0 }
  0xf7   : > { %v1518_v32 = vpop.f32.mrb[3].mxu1  ;;  %v447_v33 = vmul.f32 %v1512_v28, %v993_v20  ;;  %v438_v41 = vmul.f32 %v993_v20, %v1516_v31 }
  0xf8   : > { %452 = vadd.xlane.f32.xlu0 %v436_v29  ;;  %v446_v42 = vmul.f32 %v993_v20, %v1518_v32 }
  0xf9   : > { %458 = vadd.xlane.f32.xlu1 %v439_v30  ;;  %v1521_v34 = vpop.f32.mrb[4].mxu0 }
  0xfa   : > { %v1523_v35 = vpop.f32.mrb[4].mxu1  ;;  %v1526_v37 = vpop.f32.mrb[5].mxu0  ;;  %v441_v45 = vmul.f32 %v1521_v34, %v993_v20 }
  0xfb   : > { %v1528_v38 = vpop.f32.mrb[5].mxu1  ;;  %v440_v46 = vmul.f32 %v993_v20, %v1526_v37  ;;  %v449_v47 = vmul.f32 %v1523_v35, %v993_v20 }
  0xfc   : > { %468 = vadd.xlane.f32.xlu0 %v444_v36  ;;  %v448_v48 = vmul.f32 %v993_v20, %v1528_v38 }
  0xfd   : > { %474 = vadd.xlane.f32.xlu1 %v447_v33  ;;  %v1530_v39 = vpop.f32.mrb[6].mxu0  ;;  %v487_v33 = vld [vmem:[#allocation2] sm:$0x1] (!%p994_p5) }
  0xfe   : > { %v1532_v40 = vpop.f32.mrb[6].mxu1  ;;  %v1536_v43 = vpop.f32.mrb[7].mxu0  ;;  %v443_v49 = vmul.f32 %v1530_v39, %v993_v20 }
  0xff   : > { %v1538_v44 = vpop.f32.mrb[7].mxu1  ;;  %v442_v50 = vmul.f32 %v993_v20, %v1536_v43  ;;  %v451_v51 = vmul.f32 %v1532_v40, %v993_v20 }
 0x100   : > { %472 = vadd.xlane.f32.xlu0 %v446_v42  ;;  %v450_v52 = vmul.f32 %v993_v20, %v1538_v44 }
 0x101   : > { %456 = vadd.xlane.f32.xlu1 %v438_v41 }
 0x104   : > { %460 = vadd.xlane.f32.xlu0 %v440_v46 }
 0x105   : > { %462 = vadd.xlane.f32.xlu1 %v441_v45 }
 0x108   : > { %476 = vadd.xlane.f32.xlu0 %v448_v48 }
 0x109   : > { %478 = vadd.xlane.f32.xlu1 %v449_v47 }
 0x10c   : > { %464 = vadd.xlane.f32.xlu0 %v442_v50 }
 0x10d   : > { %466 = vadd.xlane.f32.xlu1 %v443_v49 }
 0x110   : > { %480 = vadd.xlane.f32.xlu0 %v450_v52 }
 0x111   : > { %482 = vadd.xlane.f32.xlu1 %v451_v51 }
 0x181   : > { %v455_v54 = vpop.xlane.xlu0 %454 }
 0x182   : > { %v1548_v53 = vpop.xlane.xlu1 %470 }
 0x185   : > { %v453_v55 = vpop.xlane.xlu0 %452 }
 0x186   : > { %v459_v56 = vpop.xlane.xlu1 %458 }
 0x189   : > { %v1550_v57 = vpop.xlane.xlu0 %468 }
 0x18a   : > { %v1552_v58 = vpop.xlane.xlu1 %474 }
 0x18d   : > { %v1554_v59 = vpop.xlane.xlu0 %472 }
 0x18e   : > { %v457_v60 = vpop.xlane.xlu1 %456 }
 0x191   : > { %v461_v62 = vpop.xlane.xlu0 %460 }
 0x192   : > { %v463_v61 = vpop.xlane.xlu1 %462  ;;  %v488_v5 = vmax.f32 (!%p994_p5), %v453_v55, %v461_v62 }
 0x193   : > { %v489_v6 = vmax.f32 (!%p994_p5), %v455_v54, %v463_v61 }
 0x194   : > { %v492_v9 = vmax.f32 (!%p994_p5), %v488_v5, %v1550_v57 }
 0x195   : > { %v1558_v0 = vpop.xlane.xlu0 %476  ;;  %v493_v10 = vmax.f32 (!%p994_p5), %v489_v6, %v1548_v53 }
 0x196   : > { %v1556_v63 = vpop.xlane.xlu1 %478  ;;  %v496_v13 = vmax.f32 (!%p994_p5), %v492_v9, %v1558_v0 }
 0x197   : > { %v497_v14 = vmax.f32 (!%p994_p5), %v493_v10, %v1556_v63 }
 0x198   : > { %486 = sbr.rel (%p994_p5) target bundleno = 436 (0x1b4), region = 40 }
 0x199   : > { %v465_v2 = vpop.xlane.xlu0 %464  ;;  %v500_v17 = vmax.f32 (!%p994_p5), %v496_v13, %v497_v14 }
 0x19a   : > { %v467_v1 = vpop.xlane.xlu1 %466  ;;  %v490_v7 = vmax.f32 (!%p994_p5), %v457_v60, %v465_v2 }
 0x19b   : > { %v491_v8 = vmax.f32 (!%p994_p5), %v459_v56, %v467_v1 }
 0x19c   : > { %v494_v11 = vmax.f32 (!%p994_p5), %v490_v7, %v1554_v59 }
 0x19d   : > { %v1562_v4 = vpop.xlane.xlu0 %480  ;;  %v495_v12 = vmax.f32 (!%p994_p5), %v491_v8, %v1552_v58 }
 0x19e   : > { %v1560_v3 = vpop.xlane.xlu1 %482  ;;  %v498_v15 = vmax.f32 (!%p994_p5), %v494_v11, %v1562_v4 }
 0x19f   : > { %v499_v16 = vmax.f32 %v495_v12, %v1560_v3 }
 0x1a1   : > { %v501_v18 = vmax.f32 %v498_v15, %v499_v16 }
 0x1a3   : > { %v502_v19 = vmax.f32 %v500_v17, %v501_v18 }
 0x1a5   : > { %v503_v20 = vrot.slane %v502_v19, 4 }
 0x1a7   : > { %v504_v25 = vmax.f32 %v502_v19, %v503_v20 }
 0x1a9   : > { %v505_v26 = vrot.slane %v504_v25, 2 }
 0x1ab   : > { %v506_v29 = vmax.f32 %v504_v25, %v505_v26 }
 0x1ad   : > { %v507_v30 = vrot.slane %v506_v29, 1 }
 0x1af   : > { %v508_v36 = vmax.f32 %v506_v29, %v507_v30 }
 0x1b1   : > { %v509_v41 = vmax.f32 %v487_v33, %v508_v36 }
 0x1b3   : > { %511 = vst.msk [vmem:[#allocation2] sm:$0x1] %vm510_vm2, %v509_v41 }
 0x1b4 PF: > { %p995_p6 = scmp.ne.s32.totalorder %s1364_s15, 1 }
 0x1b5   : > { %v1375_v45 = vmov (!%p995_p6), 0  }
 0x1b6   : > { %515 = sbr.rel (%p995_p6) target bundleno = 627 (0x273), region = 44  ;;  %1257 = vset.pattern.permute.xlu1 (!%p995_p6), %v1375_v45  ;;  %1256 = vset.pattern.permute.xlu0 (!%p995_p6), %v1375_v45 }
 0x1ba   : > { %v1574_v42 = vld [vmem:[#allocation2] ss:$0 sm:$0xff] (!%p995_p6) }
 0x1bb   : > { %v525_v46 = vsub.f32 (!%p995_p6), %v457_v60, %v1574_v42  ;;  %v523_v47 = vsub.f32 (!%p995_p6), %v453_v55, %v1574_v42  ;;  %v526_v48 = vsub.f32 (!%p995_p6), %v459_v56, %v1574_v42  ;;  %v524_v49 = vsub.f32 (!%p995_p6), %v455_v54, %v1574_v42 }
 0x1bc   : > { %v528_v5 = vsub.f32 (!%p995_p6), %v463_v61, %v1574_v42  ;;  %v527_v7 = vsub.f32 (!%p995_p6), %v461_v62, %v1574_v42  ;;  %v530_v60 = vsub.f32 (!%p995_p6), %v467_v1, %v1574_v42  ;;  %v529_v56 = vsub.f32 (!%p995_p6), %v465_v2, %v1574_v42 }
 0x1bd   : > { %v543_v50 = vmul.f32 1.442695, %v525_v46  ;;  %v539_v51 = vmul.f32 1.442695, %v523_v47  ;;  %v545_v52 = vmul.f32 1.442695, %v526_v48  ;;  %v532_v9 = vsub.f32 %v1548_v53, %v1574_v42 }
 0x1be   : > { %v541_v6 = vmul.f32 1.442695, %v524_v49  ;;  %v549_v8 = vmul.f32 1.442695, %v528_v5  ;;  %v547_v55 = vmul.f32 1.442695, %v527_v7  ;;  %v531_v62 = vsub.f32 %v1550_v57, %v1574_v42 }
 0x1bf   : > { %1258 = vpow2.f32 %v543_v50  ;;  %v553_v54 = vmul.f32 1.442695, %v530_v60  ;;  %v551_v61 = vmul.f32 1.442695, %v529_v56  ;;  %v557_v11 = vmul.f32 1.442695, %v532_v9 }
 0x1c0   : > { %1260 = vpow2.f32 %v539_v51  ;;  %v534_v1 = vsub.f32 %v1552_v58, %v1574_v42  ;;  %v555_v2 = vmul.f32 1.442695, %v531_v62  ;;  %v533_v13 = vsub.f32 %v1554_v59, %v1574_v42 }
 0x1c1   : > { %1262 = vpow2.f32 %v545_v52  ;;  %v536_v57 = vsub.f32 %v1556_v63, %v1574_v42  ;;  %v535_v58 = vsub.f32 %v1558_v0, %v1574_v42  ;;  %v538_v59 = vsub.f32 %v1560_v3, %v1574_v42 }
 0x1c2   : > { %1264 = vpow2.f32 %v541_v6  ;;  %v561_v15 = vmul.f32 1.442695, %v534_v1  ;;  %v559_v16 = vmul.f32 1.442695, %v533_v13  ;;  %v537_v63 = vsub.f32 %v1562_v4, %v1574_v42 }
 0x1c3   : > { %1266 = vpow2.f32 %v549_v8  ;;  %v565_v19 = vmul.f32 1.442695, %v536_v57  ;;  %v563_v20 = vmul.f32 1.442695, %v535_v58  ;;  %v569_v29 = vmul.f32 1.442695, %v538_v59 }
 0x1c4   : > { %1268 = vpow2.f32 %v547_v55  ;;  %v567_v0 = vmul.f32 1.442695, %v537_v63  ;;  %v571_v46 = vlaneseq }
 0x1c5   : > { %1270 = vpow2.f32 %v553_v54 }
 0x1c6   : > { %1272 = vpow2.f32 %v551_v61  ;;  %v1600_v47 = vand.u32 127, %v571_v46 }
 0x1c7   : > { %1274 = vpow2.f32 %v557_v11 }
 0x1c8   : > { %1276 = vpow2.f32 %v555_v2  ;;  %vm573_vm3 = vcmp.eq.s32.totalorder %v1600_v47, 32 }
 0x1c9   : > { %v1259_v10 = vpop.eup %1258  ;;  %1278 = vpow2.f32 %v561_v15 }
 0x1ca   : > { %v1261_v12 = vpop.eup %1260  ;;  %586 = vperm.xlu1 %1257, %v1259_v10   ;;  %1280 = vpow2.f32 %v559_v16 }
 0x1cb   : > { %v1263_v14 = vpop.eup %1262  ;;  %576 = vperm.xlu0 %1256, %v1261_v12   ;;  %1282 = vpow2.f32 %v565_v19 }
 0x1cc   : > { %v1265_v53 = vpop.eup %1264  ;;  %1284 = vpow2.f32 %v563_v20 }
 0x1cd   : > { %v1267_v17 = vpop.eup %1266  ;;  %1286 = vpow2.f32 %v569_v29 }
 0x1ce   : > { %591 = vperm.xlu1 %1257, %v1263_v14   ;;  %v1269_v18 = vpop.eup %1268  ;;  %1288 = vpow2.f32 %v567_v0 }
 0x1cf   : > { %581 = vperm.xlu0 %1256, %v1265_v53   ;;  %v1271_v25 = vpop.eup %1270 }
 0x1d0   : > { %v1273_v26 = vpop.eup %1272 }
 0x1d1   : > { %v1275_v30 = vpop.eup %1274 }
 0x1d2   : > { %601 = vperm.xlu1 %1257, %v1267_v17   ;;  %v1277_v33 = vpop.eup %1276 }
 0x1d3   : > { %596 = vperm.xlu0 %1256, %v1269_v18   ;;  %v1279_v3 = vpop.eup %1278 }
 0x1d4   : > { %v1281_v36 = vpop.eup %1280 }
 0x1d5   : > { %v1283_v41 = vpop.eup %1282 }
 0x1d6   : > { %611 = vperm.xlu1 %1257, %v1271_v25   ;;  %v1285_v4 = vpop.eup %1284 }
 0x1d7   : > { %606 = vperm.xlu0 %1256, %v1273_v26   ;;  %v1287_v42 = vpop.eup %1286 }
 0x1d8   : > { %v1289_v45 = vpop.eup %1288 }
 0x1da   : > { %621 = vperm.xlu1 %1257, %v1275_v30  }
 0x1db   : > { %616 = vperm.xlu0 %1256, %v1277_v33  }
 0x1de   : > { %631 = vperm.xlu1 %1257, %v1279_v3  }
 0x1df   : > { %626 = vperm.xlu0 %1256, %v1281_v36  }
 0x1e2   : > { %641 = vperm.xlu1 %1257, %v1283_v41  }
 0x1e3   : > { %636 = vperm.xlu0 %1256, %v1285_v4  }
 0x1e6   : > { %651 = vperm.xlu1 %1257, %v1287_v42  }
 0x1e7   : > { %646 = vperm.xlu0 %1256, %v1289_v45  }
 0x249   : > { %v587_v48 = vpop.permute.xlu1 %586 }
 0x24a   : > { %v577_v49 = vpop.permute.xlu0 %576  ;;  %v656_v50 = vmul.f32 %v587_v48, %v1516_v31 }
 0x24b   : > { %v654_v51 = vmul.f32 %v577_v49, %v1504_v23 }
 0x24c   : > { %v672_v8 = vsel %vm573_vm3, %v587_v48, %v656_v50 }
 0x24d   : > { %v592_v52 = vpop.permute.xlu1 %591  ;;  %v670_v55 = vsel %vm573_vm3, %v577_v49, %v654_v51 }
 0x24e   : > { %v657_v5 = vmul.f32 %v1510_v27, %v592_v52  ;;  %v582_v6 = vpop.permute.xlu0 %581 }
 0x24f   : > { %v655_v7 = vmul.f32 %v1500_v21, %v582_v6 }
 0x250   : > { %v673_v60 = vsel %vm573_vm3, %v592_v52, %v657_v5 }
 0x251   : > { %v687_v31 = vpack.c.bf16 %v673_v60, %v672_v8  ;;  %v671_v56 = vsel %vm573_vm3, %v582_v6, %v655_v7  ;;  %v602_v23 = vpop.permute.xlu1 %601 }
 0x252   : > { %v686_v54 = vpack.c.bf16 %v671_v56, %v670_v55  ;;  %v659_v27 = vmul.f32 %v1521_v34, %v602_v23  ;;  %v597_v9 = vpop.permute.xlu0 %596 }
 0x253   : > { %v696_v61 = vunpack.c.l.bf16 %v687_v31  ;;  %v697_v21 = vunpack.c.h.bf16 %v687_v31  ;;  %1148 = vst [vmem:[#allocation3 + $0x8] sm:$0xff] %v687_v31   ;;  %v658_v62 = vmul.f32 %v597_v9, %v1526_v37 }
 0x254   : > { %v694_v10 = vunpack.c.l.bf16 %v686_v54  ;;  %v695_v11 = vunpack.c.h.bf16 %v686_v54  ;;  %1072 = vst [vmem:[#allocation3] sm:$0xff] %v686_v54   ;;  %v675_v1 = vsel %vm573_vm3, %v602_v23, %v659_v27 }
 0x255   : > { %v712_v12 = vsub.f32 %v672_v8, %v696_v61  ;;  %v713_v2 = vsub.f32 %v673_v60, %v697_v21  ;;  %v674_v13 = vsel %vm573_vm3, %v597_v9, %v658_v62  ;;  %v612_v14 = vpop.permute.xlu1 %611 }
 0x256   : > { %v710_v53 = vsub.f32 %v670_v55, %v694_v10  ;;  %v711_v34 = vsub.f32 %v671_v56, %v695_v11  ;;  %v688_v15 = vpack.c.bf16 %v675_v1, %v674_v13  ;;  %v661_v57 = vmul.f32 %v1530_v39, %v612_v14  ;;  %v607_v16 = vpop.permute.xlu0 %606 }
 0x257   : > { %v1116_v58 = vpack.c.bf16 %v713_v2, %v712_v12  ;;  %v660_v37 = vmul.f32 %v607_v16, %v1536_v43 }
 0x258   : > { %v1111_v17 = vpack.c.bf16 %v711_v34, %v710_v53  ;;  %v698_v18 = vunpack.c.l.bf16 %v688_v15  ;;  %v699_v19 = vunpack.c.h.bf16 %v688_v15  ;;  %1149 = vst [vmem:[#allocation3 + $0x10] sm:$0xff] %v688_v15   ;;  %v677_v59 = vsel %vm573_vm3, %v612_v14, %v661_v57 }
 0x259   : > { %1155 = vst [vmem:[#allocation5 + $0x8] sm:$0xff] %v1116_v58   ;;  %v676_v20 = vsel %vm573_vm3, %v607_v16, %v660_v37  ;;  %v622_v63 = vpop.permute.xlu1 %621 }
 0x25a   : > { %1112 = vst [vmem:[#allocation5] sm:$0xff] %v1111_v17   ;;  %v714_v25 = vsub.f32 %v674_v13, %v698_v18  ;;  %v715_v26 = vsub.f32 %v675_v1, %v699_v19  ;;  %v689_v39 = vpack.c.bf16 %v677_v59, %v676_v20  ;;  %v663_v29 = vmul.f32 %v1502_v22, %v622_v63  ;;  %v617_v0 = vpop.permute.xlu0 %616 }
 0x25b   : > { %v662_v43 = vmul.f32 %v617_v0, %v1506_v24 }
 0x25c   : > { %v1121_v30 = vpack.c.bf16 %v715_v26, %v714_v25  ;;  %v700_v33 = vunpack.c.l.bf16 %v689_v39  ;;  %v701_v3 = vunpack.c.h.bf16 %v689_v39  ;;  %1150 = vst [vmem:[#allocation3 + $0x18] sm:$0xff] %v689_v39   ;;  %v679_v36 = vsel %vm573_vm3, %v622_v63, %v663_v29 }
 0x25d   : > { %v678_v41 = vsel %vm573_vm3, %v617_v0, %v662_v43  ;;  %v632_v4 = vpop.permute.xlu1 %631 }
 0x25e   : > { %1156 = vst [vmem:[#allocation5 + $0x10] sm:$0xff] %v1121_v30   ;;  %v716_v42 = vsub.f32 %v676_v20, %v700_v33  ;;  %v717_v45 = vsub.f32 %v677_v59, %v701_v3  ;;  %v690_v46 = vpack.c.bf16 %v679_v36, %v678_v41  ;;  %v665_v22 = vmul.f32 %v1512_v28, %v632_v4  ;;  %v627_v48 = vpop.permute.xlu0 %626 }
 0x25f   : > { %v664_v24 = vmul.f32 %v627_v48, %v1518_v32 }
 0x260   : > { %v1126_v49 = vpack.c.bf16 %v717_v45, %v716_v42  ;;  %v702_v50 = vunpack.c.l.bf16 %v690_v46  ;;  %v703_v51 = vunpack.c.h.bf16 %v690_v46  ;;  %1151 = vst [vmem:[#allocation3 + $0x20] sm:$0xff] %v690_v46   ;;  %v681_v52 = vsel %vm573_vm3, %v632_v4, %v665_v22 }
 0x261   : > { %v680_v5 = vsel %vm573_vm3, %v627_v48, %v664_v24  ;;  %v642_v6 = vpop.permute.xlu1 %641 }
 0x262   : > { %1157 = vst [vmem:[#allocation5 + $0x18] sm:$0xff] %v1126_v49   ;;  %v718_v7 = vsub.f32 %v678_v41, %v702_v50  ;;  %v719_v8 = vsub.f32 %v679_v36, %v703_v51  ;;  %v691_v60 = vpack.c.bf16 %v681_v52, %v680_v5  ;;  %v667_v28 = vmul.f32 %v1523_v35, %v642_v6  ;;  %v637_v55 = vpop.permute.xlu0 %636 }
 0x263   : > { %v666_v32 = vmul.f32 %v637_v55, %v1528_v38 }
 0x264   : > { %v1131_v31 = vpack.c.bf16 %v719_v8, %v718_v7  ;;  %v704_v56 = vunpack.c.l.bf16 %v691_v60  ;;  %v705_v23 = vunpack.c.h.bf16 %v691_v60  ;;  %1152 = vst [vmem:[#allocation3 + $0x28] sm:$0xff] %v691_v60   ;;  %v683_v54 = vsel %vm573_vm3, %v642_v6, %v667_v28 }
 0x265   : > { %v682_v27 = vsel %vm573_vm3, %v637_v55, %v666_v32  ;;  %v652_v9 = vpop.permute.xlu1 %651 }
 0x266   : > { %1158 = vst [vmem:[#allocation5 + $0x20] sm:$0xff] %v1131_v31   ;;  %v720_v61 = vsub.f32 %v680_v5, %v704_v56  ;;  %v721_v21 = vsub.f32 %v681_v52, %v705_v23  ;;  %v692_v62 = vpack.c.bf16 %v683_v54, %v682_v27  ;;  %v669_v35 = vmul.f32 %v1532_v40, %v652_v9  ;;  %v647_v10 = vpop.permute.xlu0 %646 }
 0x267   : > { %v668_v38 = vmul.f32 %v647_v10, %v1538_v44 }
 0x268   : > { %v1136_v11 = vpack.c.bf16 %v721_v21, %v720_v61  ;;  %v706_v1 = vunpack.c.l.bf16 %v692_v62  ;;  %v707_v12 = vunpack.c.h.bf16 %v692_v62  ;;  %1153 = vst [vmem:[#allocation3 + $0x30] sm:$0xff] %v692_v62   ;;  %v685_v2 = vsel %vm573_vm3, %v652_v9, %v669_v35 }
 0x269   : > { %v684_v13 = vsel %vm573_vm3, %v647_v10, %v668_v38 }
 0x26a   : > { %1159 = vst [vmem:[#allocation5 + $0x28] sm:$0xff] %v1136_v11   ;;  %v722_v14 = vsub.f32 %v682_v27, %v706_v1  ;;  %v723_v53 = vsub.f32 %v683_v54, %v707_v12  ;;  %v693_v34 = vpack.c.bf16 %v685_v2, %v684_v13 }
 0x26c   : > { %v1141_v15 = vpack.c.bf16 %v723_v53, %v722_v14  ;;  %v708_v57 = vunpack.c.l.bf16 %v693_v34  ;;  %v709_v40 = vunpack.c.h.bf16 %v693_v34  ;;  %1154 = vst [vmem:[#allocation3 + $0x38] sm:$0xff] %v693_v34  }
 0x26e   : > { %1160 = vst [vmem:[#allocation5 + $0x30] sm:$0xff] %v1141_v15   ;;  %v724_v44 = vsub.f32 %v684_v13, %v708_v57  ;;  %v725_v16 = vsub.f32 %v685_v2, %v709_v40 }
 0x270   : > { %v1146_v58 = vpack.c.bf16 %v725_v16, %v724_v44 }
 0x272   : > { %1161 = vst [vmem:[#allocation5 + $0x38] sm:$0xff] %v1146_v58  }
 0x273 PF: > { %p1653_p7 = scmp.eq.s32.totalorder %s972_s18, 1  ;;  %s1376_s11 = smov [#allocation3]  }
 0x274   : > { %s887_s12 = sshll.u32 %s1376_s11, 4  ;;  %s888_s12 = int_to_ptr.vmem [resolvable:$true] %s887_s12 }
 0x275   : > { %s1290_s13 = scalar_lea.vmem %s888_s12, 1024  ;;  %p1297_p11 = scmp.lt.s32.totalorder %s888_s12, %s888_s12 }
 0x276   : > { %p1291_p8 = scmp.ne.s32.totalorder %s888_s12, %s1290_s13  ;;  %p1298_p12 = scmp.lt.s32.totalorder %s1290_s13, %s1290_s13 }
 0x278   : > { %p1292_p9 = pnand %p1291_p8, %p1653_p7  ;;  %p1299_p13 = por %p1298_p12, %p1297_p11 }
 0x27a   : > { %p1293_p10 = pneg %p1292_p9 }
 0x27c   : > { %p1300_p0 = pnand %p1299_p13, %p1293_p10 }
 0x27e   : > { %1303 = shalt.err (!%p1300_p0)
}
 0x27f   : > { %s1304_s18 = scalar_lea.hbm %s1713_s3, 1024 }
 0x280   : > { %p1305_p1 = scmp.ne.s32.totalorder %s1713_s3, %s1304_s18  ;;  %p1310_p4 = scmp.lt.u32.totalorder %s1304_s18, %s1713_s3 }
 0x282   : > { %p1306_p2 = pnand %p1305_p1, %p1653_p7 }
 0x284   : > { %p1307_p3 = pneg %p1306_p2 }
 0x286   : > { %p1312_p5 = pnand %p1310_p4, %p1307_p3 }
 0x288   : > { %1315 = shalt.err (!%p1312_p5)
}
 0x289   : > { %s1377_s25 = smov 64   ;;  %s1378_s26 = smov 4  }
 0x28a   : > { %1215 = dma.vmem_to_hbm [thread:$0]  (%p1653_p7), %s888_s12, 1024, %s1713_s3, [#allocation4], %s1377_s25, %s1377_s25, %s1378_s26  }
 0x28b   : > { %s1379_s29 = smov [#allocation5]  }
 0x28c   : > { %s903_s30 = sshll.u32 %s1379_s29, 4  ;;  %s904_s30 = int_to_ptr.vmem [resolvable:$true] %s903_s30 }
 0x28d   : > { %s1316_s5 = scalar_lea.vmem %s904_s30, 1024  ;;  %p1323_p10 = scmp.lt.s32.totalorder %s904_s30, %s904_s30 }
 0x28e   : > { %p1317_p6 = scmp.ne.s32.totalorder %s904_s30, %s1316_s5  ;;  %p1324_p11 = scmp.lt.s32.totalorder %s1316_s5, %s1316_s5 }
 0x290   : > { %p1318_p8 = pnand %p1317_p6, %p1653_p7  ;;  %p1325_p12 = por %p1324_p11, %p1323_p10 }
 0x292   : > { %p1319_p9 = pneg %p1318_p8 }
 0x294   : > { %p1326_p13 = pnand %p1325_p12, %p1319_p9 }
 0x296   : > { %1329 = shalt.err (!%p1326_p13)
}
 0x297   : > { %s1330_s8 = scalar_lea.hbm %s1714_s4, 1024 }
 0x298   : > { %p1331_p0 = scmp.ne.s32.totalorder %s1714_s4, %s1330_s8  ;;  %p1336_p3 = scmp.lt.u32.totalorder %s1330_s8, %s1714_s4 }
 0x29a   : > { %p1332_p1 = pnand %p1331_p0, %p1653_p7 }
 0x29c   : > { %p1333_p2 = pneg %p1332_p1 }
 0x29e   : > { %p1338_p4 = pnand %p1336_p3, %p1333_p2 }
 0x2a0   : > { %1341 = shalt.err (!%p1338_p4)
}
 0x2a1   : > { %1217 = dma.vmem_to_hbm [thread:$0]  (%p1653_p7), %s904_s30, 1024, %s1714_s4, [#allocation6], %s1377_s25, %s1377_s25, %s1378_s26  }
 0x2a2   : > { %1355 = dma.done.wait (%p1653_p7), [#allocation4], 1024  }
 0x2a3   : > { %1357 = vsyncadd (%p1653_p7), [#allocation4], 4294966272 }
 0x2a4   : > { %1359 = dma.done.wait (%p1653_p7), [#allocation6], 1024  }
 0x2a5   : > { %1361 = vsyncadd (%p1653_p7), [#allocation6], 4294966272 }
 0x2a6 PF: > { %s17_s17 = sadd.s32 1, %s1372_s17   ;;  %s1716_s15 = smov %s1368_s16 }
 0x2a7   : > { %p14_p5 = scmp.ge.s32.totalorder %s17_s17, 4   ;;  %s1717_s16 = smov %s1719_s19 }
 0x2a9   :  { %16 = sbr.rel (!%p14_p5) target bundleno = 3 (0x3), region = 81 }
 0x2b0   :  { %923 = vsyncpa [#allocation4], 1 }
 0x2b1   :  { %925 = vsyncpa [#allocation4 + $0x1], 1 }
 0x2b2   :  { %926 = vsyncpa [#allocation6], 1 }

</bundles_post_ra>
